<compile_context>
chip_gen: v7x
topology: tpu7x:2x2x1
jax: 0.10.0
libtpu: 0.0.40
codegen_flags: <defaults>
</compile_context>

<pallas_src>
import functools
import math

import jax
import jax.numpy as jnp
from jax.experimental import pallas as pl
from jax.experimental.pallas import tpu as pltpu

ENC_DIM = 40
DIM = 40
BN_EPS = 1e-5

# Stats pass stays f32 so BN statistics are exact; apply pass uses bf16 MXU
# operands (f32 accumulate).  Flip APPLY_MATMUL_DTYPE to jnp.float32 for
# bit-faithful outputs (then tighten tolerances in __main__ to ~5e-4).
STATS_MATMUL_DTYPE = jnp.float32
APPLY_MATMUL_DTYPE = jnp.bfloat16

DEFAULT_TILE_N = 8192     # review: 4K-16K amortizes per-step overhead
MAX_TILE_N = 16384        # keeps per-call VMEM under the 32 MiB scoped default


def _round_up(x, m):
    return (x + m - 1) // m * m


def _plan_tiles(n, tile_n):
    """Row tile (multiple of 8), padded N, tile count.

    Clamp so there are >=2 tiles whenever n allows it (v7x megacore: two
    TensorCores share the "parallel" grid axis) and so a single tile never
    exceeds MAX_TILE_N (VMEM guard for v7x's 64 MiB physical / 32 MiB scoped).
    """
    half = _round_up(max(-(-n // 2), 8), 8)
    tn = max(8, min(tile_n, MAX_TILE_N, half))
    n_pad = _round_up(n, tn)
    return tn, n_pad, n_pad // tn


def _vmem_limit(tn):
    # double-buffered r tile + f32/bf16 intermediates + weights + slack,
    # capped at the 32 MiB scoped default so it is safe on v7x as well.
    return int(min(32 * 1024 * 1024, 4 * 1024 * 1024 + 10 * tn * DIM * 4))


def _mm(a, b, dtype):
    return jnp.dot(a.astype(dtype), b.astype(dtype),
                   preferred_element_type=jnp.float32)


# --------------------------------------------------------------------------
# Kernels
# --------------------------------------------------------------------------
def _make_stats_kernel(tn, n_valid, num_tiles, need_mask):
    """Per-tile column sums and 40x40 Gram matrix of h1 = relu(r @ w1 + b1)."""

    def emit(h, s_ref, g_ref):
        s_ref[...] = jnp.sum(h, axis=0, keepdims=True)[None]
        # G = h^T h via dot_general contracting the row axis (no explicit
        # transpose of the big operand), f32 accumulate on the MXU.
        g_ref[...] = jax.lax.dot_general(
            h, h, dimension_numbers=(((0,), (0,)), ((), ())),
            preferred_element_type=jnp.float32)[None]

    def kernel(r_ref, w1_ref, b1_ref, s_ref, g_ref):
        h = jnp.maximum(
            _mm(r_ref[...], w1_ref[...], STATS_MATMUL_DTYPE) + b1_ref[...],
            0.0)
        if not need_mask:
            emit(h, s_ref, g_ref)
        else:
            last = num_tiles - 1

            # Fast path: interior tiles have no padded rows -> no mask work.
            @pl.when(pl.program_id(0) != last)
            def _():
                emit(h, s_ref, g_ref)

            @pl.when(pl.program_id(0) == last)
            def _():
                row = (jax.lax.broadcasted_iota(jnp.int32, (tn, 1), 0)
                       + last * tn)
                emit(jnp.where(row < n_valid, h, 0.0), s_ref, g_ref)

    return kernel


def _apply_kernel(r_ref, w1_ref, b1_ref, w2_ref, b2_ref, wh_ref, bh_ref,
                  out_ref):
    """Fully folded network: both BNs baked into (w2, b2); heads fused in wh/bh."""
    dt = APPLY_MATMUL_DTYPE
    h = jnp.maximum(_mm(r_ref[...], w1_ref[...], dt) + b1_ref[...], 0.0)
    h = jnp.maximum(_mm(h, w2_ref[...], dt) + b2_ref[...], 0.0)
    out_ref[...] = _mm(h, wh_ref[...], dt) + bh_ref[...]


# --------------------------------------------------------------------------
# Wrapper
# --------------------------------------------------------------------------
@functools.partial(jax.jit, static_argnames=("tile_n",))
def r2z_forward(r, params, *, tile_n=DEFAULT_TILE_N):
    """r: (N, ENC_DIM) float32. Returns (mean (N,1), log_cov (N,1))."""
    n = r.shape[0]
    tn, n_pad, num_tiles = _plan_tiles(n, tile_n)
    need_mask = n_pad != n
    r_p = jnp.pad(r, ((0, n_pad - n), (0, 0))) if need_mask else r

    row_spec = pl.BlockSpec((tn, ENC_DIM), lambda i: (i, 0))

    def w_spec(shape):  # constant index_map -> fetched once, stays VMEM-resident
        return pl.BlockSpec(shape, lambda i: (0, 0))

    cparams = pltpu.CompilerParams(dimension_semantics=("parallel",),
                                   vmem_limit_bytes=_vmem_limit(tn))

    # --- pass 1: streaming column sums + Gram of h1 = relu(r@w1+b1) --------
    s_parts, g_parts = pl.pallas_call(
        _make_stats_kernel(tn, n, num_tiles, need_mask),
        grid=(num_tiles,),
        in_specs=[row_spec, w_spec((ENC_DIM, DIM)), w_spec((1, DIM))],
        out_specs=(pl.BlockSpec((1, 1, DIM), lambda i: (i, 0, 0)),
                   pl.BlockSpec((1, DIM, DIM), lambda i: (i, 0, 0))),
        out_shape=(jax.ShapeDtypeStruct((num_tiles, 1, DIM), jnp.float32),
                   jax.ShapeDtypeStruct((num_tiles, DIM, DIM), jnp.float32)),
        compiler_params=cparams,
    )(r_p, params["w1"], params["b1"])

    s1 = jnp.sum(s_parts, axis=0)                       # (1, DIM)
    gram1 = jnp.sum(g_parts, axis=0)                    # (DIM, DIM) = h1^T h1
    mu1 = s1 / n
    e2_1 = jnp.diagonal(gram1)[None, :] / n             # E[h1^2]
    var1 = jnp.maximum(e2_1 - mu1 * mu1, 0.0)           # biased batch variance
    scale1 = params["g1"] * jax.lax.rsqrt(var1 + BN_EPS)
    shift1 = params["beta1"] - mu1 * scale1
    # Fold BN1 into Linear #2:  bn1(h1) @ w2 + b2 == h1 @ w2e + b2e
    w2e = params["w2"] * scale1.reshape(DIM, 1)
    b2e = shift1 @ params["w2"] + params["b2"]

    # BN2 stats from the Gram (no second streaming pass over r):
    #   h2 = h1 @ w2e + b2e
    #   mean2 = mu1 @ w2e + b2e
    #   var2_j = w2e[:,j]^T Cov(h1) w2e[:,j],  Cov(h1) = G/n - mu1^T mu1
    mu2 = mu1 @ w2e + b2e
    cov1 = gram1 / n - mu1.T @ mu1
    var2 = jnp.maximum(jnp.sum(w2e * (cov1 @ w2e), axis=0, keepdims=True), 0.0)
    scale2 = params["g2"] * jax.lax.rsqrt(var2 + BN_EPS)
    shift2 = params["beta2"] - mu2 * scale2
    # Fold BN2 into the (already BN1-folded) second layer as well.
    w2f = w2e * scale2
    b2f = b2e * scale2 + shift2
    # Fuse the two heads into one (DIM, 2) matmul / one (N, 2) output slab.
    wh = jnp.concatenate([params["wm"], params["wc"]], axis=1)
    bh = jnp.concatenate([params["bm"], params["bc"]], axis=1)

    # --- pass 2: apply folded network, emit fused heads ---------------------
    out = pl.pallas_call(
        _apply_kernel,
        grid=(num_tiles,),
        in_specs=[row_spec, w_spec((ENC_DIM, DIM)), w_spec((1, DIM)),
                  w_spec((DIM, DIM)), w_spec((1, DIM)),
                  w_spec((DIM, 2)), w_spec((1, 2))],
        out_specs=pl.BlockSpec((tn, 2), lambda i: (i, 0)),
        out_shape=jax.ShapeDtypeStruct((n_pad, 2), jnp.float32),
        compiler_params=cparams,
    )(r_p, params["w1"], params["b1"], w2f, b2f, wh, bh)
    return out[:n, 0:1], out[:n, 1:2]


# --------------------------------------------------------------------------
# Params / reference
# --------------------------------------------------------------------------
def init_params(key):
    """Deterministic PyTorch-style init. Linear weights stored as (in, out)."""

    def linear(key, fan_in, fan_out):
        kw, kb = jax.random.split(key)
        bound = 1.0 / math.sqrt(fan_in)
        w = jax.random.uniform(kw, (fan_in, fan_out), jnp.float32, -bound, bound)
        b = jax.random.uniform(kb, (1, fan_out), jnp.float32, -bound, bound)
        return w, b

    k1, k2, k3, k4 = jax.random.split(key, 4)
    w1, b1 = linear(k1, ENC_DIM, DIM)
    w2, b2 = linear(k2, DIM, DIM)
    wm, bm = linear(k3, DIM, 1)
    wc, bc = linear(k4, DIM, 1)
    g1 = jnp.ones((1, DIM), jnp.float32)
    beta1 = jnp.zeros((1, DIM), jnp.float32)
    g2 = jnp.ones((1, DIM), jnp.float32)
    beta2 = jnp.zeros((1, DIM), jnp.float32)
    return dict(w1=w1, b1=b1, g1=g1, beta1=beta1,
                w2=w2, b2=b2, g2=g2, beta2=beta2,
                wm=wm, bm=bm, wc=wc, bc=bc)


def r2z_reference(r, p):
    """Pure-JAX reference (direct training-mode BatchNorm) for sanity checking."""
    h = jnp.maximum(r @ p["w1"] + p["b1"], 0.0)
    mu = h.mean(0, keepdims=True)
    var = ((h - mu) ** 2).mean(0, keepdims=True)
    h = (h - mu) / jnp.sqrt(var + BN_EPS) * p["g1"] + p["beta1"]
    h = h @ p["w2"] + p["b2"]
    mu = h.mean(0, keepdims=True)
    var = ((h - mu) ** 2).mean(0, keepdims=True)
    h = (h - mu) / jnp.sqrt(var + BN_EPS) * p["g2"] + p["beta2"]
    h = jnp.maximum(h, 0.0)
    return h @ p["wm"] + p["bm"], h @ p["wc"] + p["bc"]


if __name__ == "__main__":
    key = jax.random.PRNGKey(0)
    k_params, k_input = jax.random.split(key)
    params = init_params(k_params)

    # bf16 apply-pass operands -> looser tolerance; f32 would allow 5e-4.
    tol = 5e-2 if APPLY_MATMUL_DTYPE == jnp.bfloat16 else 5e-4

    # (N, tile_n) configs exercise: multi-tile grid with row masking,
    # minimum-size tiles with masking, and an unmasked two-tile path.
    for n_rows, tile_n in ((200, 64), (24, DEFAULT_TILE_N), (512, DEFAULT_TILE_N)):
        r = jax.random.normal(jax.random.fold_in(k_input, n_rows),
                              (n_rows, ENC_DIM), jnp.float32)
        mean_out, logcov_out = r2z_forward(r, params, tile_n=tile_n)
        jax.block_until_ready((mean_out, logcov_out))

        ref_mean, ref_logcov = r2z_reference(r, params)
        assert mean_out.shape == (n_rows, 1) and logcov_out.shape == (n_rows, 1)
        assert jnp.allclose(mean_out, ref_mean, atol=tol, rtol=tol), (
            f"mean mismatch at n={n_rows}")
        assert jnp.allclose(logcov_out, ref_logcov, atol=tol, rtol=tol), (
            f"log_cov mismatch at n={n_rows}")

    print("KERNEL_OK")
</pallas_src>

<mosaic_0001>
module attributes {stable_mosaic.version = 11 : i64} {
  func.func @kernel(%arg0: i32, %arg1: memref<64x40xf32, #tpu.memory_space<vmem>>, %arg2: memref<40x40xf32, #tpu.memory_space<vmem>>, %arg3: memref<1x40xf32, #tpu.memory_space<vmem>>, %arg4: memref<1x1x40xf32, #tpu.memory_space<vmem>>, %arg5: memref<1x40x40xf32, #tpu.memory_space<vmem>>) attributes {dimension_semantics = [#tpu.dimension_semantics<parallel>], iteration_bounds = array<i64: 4>, scalar_prefetch = 0 : i64, scratch_operands = 0 : i64, tpu.core_type = #tpu.core_type<tc>, window_params = [{transform_indices = @transform_0, window_bounds = array<i64: 64, 40>}, {pipeline_mode = #tpu.pipeline_mode<synchronous>, transform_indices = @transform_1, window_bounds = array<i64: 40, 40>}, {pipeline_mode = #tpu.pipeline_mode<synchronous>, transform_indices = @transform_2, window_bounds = array<i64: 1, 40>}, {transform_indices = @transform_3, window_bounds = array<i64: 1, 1, 40>}, {transform_indices = @transform_4, window_bounds = array<i64: 1, 40, 40>}]} {
    %c0 = arith.constant 0 : index
    %c0_0 = arith.constant 0 : index
    %0 = vector.load %arg1[%c0, %c0_0] : memref<64x40xf32, #tpu.memory_space<vmem>>, vector<64x40xf32>
    %c0_1 = arith.constant 0 : index
    %c0_2 = arith.constant 0 : index
    %1 = vector.load %arg2[%c0_1, %c0_2] : memref<40x40xf32, #tpu.memory_space<vmem>>, vector<40x40xf32>
    %cst = arith.constant dense<0.000000e+00> : vector<64x40xf32>
    %2 = tpu.matmul %0, %1, %cst {dimension_numbers = #tpu.dot_dimension_numbers<[1], [0], [0], [1], [0, 0, 1, 1], [], []>} : vector<64x40xf32>, vector<40x40xf32>, vector<64x40xf32> -> vector<64x40xf32>
    %c0_3 = arith.constant 0 : index
    %c0_4 = arith.constant 0 : index
    %3 = vector.load %arg3[%c0_3, %c0_4] : memref<1x40xf32, #tpu.memory_space<vmem>>, vector<1x40xf32>
    %4 = vector.broadcast %3 : vector<1x40xf32> to vector<64x40xf32>
    %5 = arith.addf %2, %4 : vector<64x40xf32>
    %cst_5 = arith.constant 0.000000e+00 : f32
    %6 = vector.broadcast %cst_5 : f32 to vector<64x40xf32>
    %7 = arith.maximumf %5, %6 : vector<64x40xf32>
    %c3_i32 = arith.constant 3 : i32
    %8 = arith.cmpi ne, %arg0, %c3_i32 : i32
    %9 = arith.extui %8 : i1 to i32
    %c0_i32 = arith.constant 0 : i32
    %10 = arith.cmpi ne, %9, %c0_i32 : i32
    scf.if %10 {
      %cst_8 = arith.constant dense<0.000000e+00> : vector<40xf32>
      %14 = vector.multi_reduction <add>, %7, %cst_8 [0] : vector<64x40xf32> to vector<40xf32>
      %15 = vector.shape_cast %14 : vector<40xf32> to vector<1x40xf32>
      %16 = vector.shape_cast %15 : vector<1x40xf32> to vector<1x1x40xf32>
      %c0_9 = arith.constant 0 : index
      %c0_10 = arith.constant 0 : index
      %c0_11 = arith.constant 0 : index
      %17 = vector.load %arg4[%c0_9, %c0_10, %c0_11] : memref<1x1x40xf32, #tpu.memory_space<vmem>>, vector<1x1x40xf32>
      tpu.vector_store %arg4[%c0_9, %c0_10, %c0_11], %16 {strides = array<i32>} : memref<1x1x40xf32, #tpu.memory_space<vmem>>, vector<1x1x40xf32>,
      %cst_12 = arith.constant dense<0.000000e+00> : vector<40x40xf32>
      %18 = tpu.matmul %7, %7, %cst_12 {dimension_numbers = #tpu.dot_dimension_numbers<[0], [0], [1], [1], [0, 1, 1, 1], [], []>} : vector<64x40xf32>, vector<64x40xf32>, vector<40x40xf32> -> vector<40x40xf32>
      %19 = vector.shape_cast %18 : vector<40x40xf32> to vector<1x40x40xf32>
      %c0_13 = arith.constant 0 : index
      %c0_14 = arith.constant 0 : index
      %c0_15 = arith.constant 0 : index
      %20 = vector.load %arg5[%c0_13, %c0_14, %c0_15] : memref<1x40x40xf32, #tpu.memory_space<vmem>>, vector<1x40x40xf32>
      tpu.vector_store %arg5[%c0_13, %c0_14, %c0_15], %19 {strides = array<i32>} : memref<1x40x40xf32, #tpu.memory_space<vmem>>, vector<1x40x40xf32>,
    } else {
    }
    %c3_i32_6 = arith.constant 3 : i32
    %11 = arith.cmpi eq, %arg0, %c3_i32_6 : i32
    %12 = arith.extui %11 : i1 to i32
    %c0_i32_7 = arith.constant 0 : i32
    %13 = arith.cmpi ne, %12, %c0_i32_7 : i32
    scf.if %13 {
      %14 = tpu.iota {dimensions = array<i32: 0>} : vector<64x1xi32>
      %c192_i32 = arith.constant 192 : i32
      %15 = vector.broadcast %c192_i32 : i32 to vector<64x1xi32>
      %16 = arith.addi %14, %15 : vector<64x1xi32>
      %c200_i32 = arith.constant 200 : i32
      %17 = vector.broadcast %c200_i32 : i32 to vector<64x1xi32>
      %18 = arith.cmpi slt, %16, %17 : vector<64x1xi32>
      %cst_8 = arith.constant 0.000000e+00 : f32
      %19 = vector.shape_cast %18 : vector<64x1xi1> to vector<64x1xi1>
      %20 = vector.broadcast %19 : vector<64x1xi1> to vector<64x40xi1>
      %21 = vector.broadcast %cst_8 : f32 to vector<64x40xf32>
      %22 = arith.select %20, %7, %21 : vector<64x40xi1>, vector<64x40xf32>
      %cst_9 = arith.constant dense<0.000000e+00> : vector<40xf32>
      %23 = vector.multi_reduction <add>, %22, %cst_9 [0] : vector<64x40xf32> to vector<40xf32>
      %24 = vector.shape_cast %23 : vector<40xf32> to vector<1x40xf32>
      %25 = vector.shape_cast %24 : vector<1x40xf32> to vector<1x1x40xf32>
      %c0_10 = arith.constant 0 : index
      %c0_11 = arith.constant 0 : index
      %c0_12 = arith.constant 0 : index
      %26 = vector.load %arg4[%c0_10, %c0_11, %c0_12] : memref<1x1x40xf32, #tpu.memory_space<vmem>>, vector<1x1x40xf32>
      tpu.vector_store %arg4[%c0_10, %c0_11, %c0_12], %25 {strides = array<i32>} : memref<1x1x40xf32, #tpu.memory_space<vmem>>, vector<1x1x40xf32>,
      %cst_13 = arith.constant dense<0.000000e+00> : vector<40x40xf32>
      %27 = tpu.matmul %22, %22, %cst_13 {dimension_numbers = #tpu.dot_dimension_numbers<[0], [0], [1], [1], [0, 1, 1, 1], [], []>} : vector<64x40xf32>, vector<64x40xf32>, vector<40x40xf32> -> vector<40x40xf32>
      %28 = vector.shape_cast %27 : vector<40x40xf32> to vector<1x40x40xf32>
      %c0_14 = arith.constant 0 : index
      %c0_15 = arith.constant 0 : index
      %c0_16 = arith.constant 0 : index
      %29 = vector.load %arg5[%c0_14, %c0_15, %c0_16] : memref<1x40x40xf32, #tpu.memory_space<vmem>>, vector<1x40x40xf32>
      tpu.vector_store %arg5[%c0_14, %c0_15, %c0_16], %28 {strides = array<i32>} : memref<1x40x40xf32, #tpu.memory_space<vmem>>, vector<1x40x40xf32>,
    } else {
    }
    return
  }
  func.func @transform_0(%arg0: i32) -> (i32, i32) {
    %c0_i32 = arith.constant 0 : i32
    %c0_i32_0 = arith.constant 0 : i32
    return %arg0, %c0_i32 : i32, i32
  }
  func.func @transform_1(%arg0: i32) -> (i32, i32) {
    %c0_i32 = arith.constant 0 : i32
    %c0_i32_0 = arith.constant 0 : i32
    %c0_i32_1 = arith.constant 0 : i32
    return %c0_i32, %c0_i32_0 : i32, i32
  }
  func.func @transform_2(%arg0: i32) -> (i32, i32) {
    %c0_i32 = arith.constant 0 : i32
    %c0_i32_0 = arith.constant 0 : i32
    %c0_i32_1 = arith.constant 0 : i32
    return %c0_i32, %c0_i32_0 : i32, i32
  }
  func.func @transform_3(%arg0: i32) -> (i32, i32, i32) {
    %c0_i32 = arith.constant 0 : i32
    %c0_i32_0 = arith.constant 0 : i32
    %c0_i32_1 = arith.constant 0 : i32
    return %arg0, %c0_i32, %c0_i32_0 : i32, i32, i32
  }
  func.func @transform_4(%arg0: i32) -> (i32, i32, i32) {
    %c0_i32 = arith.constant 0 : i32
    %c0_i32_0 = arith.constant 0 : i32
    %c0_i32_1 = arith.constant 0 : i32
    return %arg0, %c0_i32, %c0_i32_0 : i32, i32, i32
  }
}

module attributes {stable_mosaic.version = 11 : i64} {
  func.func @_apply_kernel(%arg0: i32, %arg1: memref<64x40xf32, #tpu.memory_space<vmem>>, %arg2: memref<40x40xf32, #tpu.memory_space<vmem>>, %arg3: memref<1x40xf32, #tpu.memory_space<vmem>>, %arg4: memref<40x40xf32, #tpu.memory_space<vmem>>, %arg5: memref<1x40xf32, #tpu.memory_space<vmem>>, %arg6: memref<40x2xf32, #tpu.memory_space<vmem>>, %arg7: memref<1x2xf32, #tpu.memory_space<vmem>>, %arg8: memref<64x2xf32, #tpu.memory_space<vmem>>) attributes {dimension_semantics = [#tpu.dimension_semantics<parallel>], iteration_bounds = array<i64: 4>, scalar_prefetch = 0 : i64, scratch_operands = 0 : i64, tpu.core_type = #tpu.core_type<tc>, window_params = [{transform_indices = @transform_0, window_bounds = array<i64: 64, 40>}, {pipeline_mode = #tpu.pipeline_mode<synchronous>, transform_indices = @transform_1, window_bounds = array<i64: 40, 40>}, {pipeline_mode = #tpu.pipeline_mode<synchronous>, transform_indices = @transform_2, window_bounds = array<i64: 1, 40>}, {pipeline_mode = #tpu.pipeline_mode<synchronous>, transform_indices = @transform_3, window_bounds = array<i64: 40, 40>}, {pipeline_mode = #tpu.pipeline_mode<synchronous>, transform_indices = @transform_4, window_bounds = array<i64: 1, 40>}, {pipeline_mode = #tpu.pipeline_mode<synchronous>, transform_indices = @transform_5, window_bounds = array<i64: 40, 2>}, {pipeline_mode = #tpu.pipeline_mode<synchronous>, transform_indices = @transform_6, window_bounds = array<i64: 1, 2>}, {transform_indices = @transform_7, window_bounds = array<i64: 64, 2>}]} {
    %c0 = arith.constant 0 : index
    %c0_0 = arith.constant 0 : index
    %0 = vector.load %arg1[%c0, %c0_0] : memref<64x40xf32, #tpu.memory_space<vmem>>, vector<64x40xf32>
    %c0_1 = arith.constant 0 : index
    %c0_2 = arith.constant 0 : index
    %1 = vector.load %arg2[%c0_1, %c0_2] : memref<40x40xf32, #tpu.memory_space<vmem>>, vector<40x40xf32>
    %2 = arith.truncf %0 : vector<64x40xf32> to vector<64x40xbf16>
    %3 = arith.truncf %1 : vector<40x40xf32> to vector<40x40xbf16>
    %cst = arith.constant dense<0.000000e+00> : vector<64x40xf32>
    %4 = tpu.matmul %2, %3, %cst {dimension_numbers = #tpu.dot_dimension_numbers<[1], [0], [0], [1], [0, 0, 1, 1], [], []>} : vector<64x40xbf16>, vector<40x40xbf16>, vector<64x40xf32> -> vector<64x40xf32>
    %c0_3 = arith.constant 0 : index
    %c0_4 = arith.constant 0 : index
    %5 = vector.load %arg3[%c0_3, %c0_4] : memref<1x40xf32, #tpu.memory_space<vmem>>, vector<1x40xf32>
    %6 = vector.broadcast %5 : vector<1x40xf32> to vector<64x40xf32>
    %7 = arith.addf %4, %6 : vector<64x40xf32>
    %cst_5 = arith.constant 0.000000e+00 : f32
    %8 = vector.broadcast %cst_5 : f32 to vector<64x40xf32>
    %9 = arith.maximumf %7, %8 : vector<64x40xf32>
    %c0_6 = arith.constant 0 : index
    %c0_7 = arith.constant 0 : index
    %10 = vector.load %arg4[%c0_6, %c0_7] : memref<40x40xf32, #tpu.memory_space<vmem>>, vector<40x40xf32>
    %11 = arith.truncf %9 : vector<64x40xf32> to vector<64x40xbf16>
    %12 = arith.truncf %10 : vector<40x40xf32> to vector<40x40xbf16>
    %cst_8 = arith.constant dense<0.000000e+00> : vector<64x40xf32>
    %13 = tpu.matmul %11, %12, %cst_8 {dimension_numbers = #tpu.dot_dimension_numbers<[1], [0], [0], [1], [0, 0, 1, 1], [], []>} : vector<64x40xbf16>, vector<40x40xbf16>, vector<64x40xf32> -> vector<64x40xf32>
    %c0_9 = arith.constant 0 : index
    %c0_10 = arith.constant 0 : index
    %14 = vector.load %arg5[%c0_9, %c0_10] : memref<1x40xf32, #tpu.memory_space<vmem>>, vector<1x40xf32>
    %15 = vector.broadcast %14 : vector<1x40xf32> to vector<64x40xf32>
    %16 = arith.addf %13, %15 : vector<64x40xf32>
    %cst_11 = arith.constant 0.000000e+00 : f32
    %17 = vector.broadcast %cst_11 : f32 to vector<64x40xf32>
    %18 = arith.maximumf %16, %17 : vector<64x40xf32>
    %c0_12 = arith.constant 0 : index
    %c0_13 = arith.constant 0 : index
    %19 = vector.load %arg6[%c0_12, %c0_13] : memref<40x2xf32, #tpu.memory_space<vmem>>, vector<40x2xf32>
    %20 = arith.truncf %18 : vector<64x40xf32> to vector<64x40xbf16>
    %21 = arith.truncf %19 : vector<40x2xf32> to vector<40x2xbf16>
    %cst_14 = arith.constant dense<0.000000e+00> : vector<64x2xf32>
    %22 = tpu.matmul %20, %21, %cst_14 {dimension_numbers = #tpu.dot_dimension_numbers<[1], [0], [0], [1], [0, 0, 1, 1], [], []>} : vector<64x40xbf16>, vector<40x2xbf16>, vector<64x2xf32> -> vector<64x2xf32>
    %c0_15 = arith.constant 0 : index
    %c0_16 = arith.constant 0 : index
    %23 = vector.load %arg7[%c0_15, %c0_16] : memref<1x2xf32, #tpu.memory_space<vmem>>, vector<1x2xf32>
    %24 = vector.broadcast %23 : vector<1x2xf32> to vector<64x2xf32>
    %25 = arith.addf %22, %24 : vector<64x2xf32>
    %c0_17 = arith.constant 0 : index
    %c0_18 = arith.constant 0 : index
    %26 = vector.load %arg8[%c0_17, %c0_18] : memref<64x2xf32, #tpu.memory_space<vmem>>, vector<64x2xf32>
    tpu.vector_store %arg8[%c0_17, %c0_18], %25 {strides = array<i32>} : memref<64x2xf32, #tpu.memory_space<vmem>>, vector<64x2xf32>,
    return
  }
  func.func @transform_0(%arg0: i32) -> (i32, i32) {
    %c0_i32 = arith.constant 0 : i32
    %c0_i32_0 = arith.constant 0 : i32
    return %arg0, %c0_i32 : i32, i32
  }
  func.func @transform_1(%arg0: i32) -> (i32, i32) {
    %c0_i32 = arith.constant 0 : i32
    %c0_i32_0 = arith.constant 0 : i32
    %c0_i32_1 = arith.constant 0 : i32
    return %c0_i32, %c0_i32_0 : i32, i32
  }
  func.func @transform_2(%arg0: i32) -> (i32, i32) {
    %c0_i32 = arith.constant 0 : i32
    %c0_i32_0 = arith.constant 0 : i32
    %c0_i32_1 = arith.constant 0 : i32
    return %c0_i32, %c0_i32_0 : i32, i32
  }
  func.func @transform_3(%arg0: i32) -> (i32, i32) {
    %c0_i32 = arith.constant 0 : i32
    %c0_i32_0 = arith.constant 0 : i32
    %c0_i32_1 = arith.constant 0 : i32
    return %c0_i32, %c0_i32_0 : i32, i32
  }
  func.func @transform_4(%arg0: i32) -> (i32, i32) {
    %c0_i32 = arith.constant 0 : i32
    %c0_i32_0 = arith.constant 0 : i32
    %c0_i32_1 = arith.constant 0 : i32
    return %c0_i32, %c0_i32_0 : i32, i32
  }
  func.func @transform_5(%arg0: i32) -> (i32, i32) {
    %c0_i32 = arith.constant 0 : i32
    %c0_i32_0 = arith.constant 0 : i32
    %c0_i32_1 = arith.constant 0 : i32
    return %c0_i32, %c0_i32_0 : i32, i32
  }
  func.func @transform_6(%arg0: i32) -> (i32, i32) {
    %c0_i32 = arith.constant 0 : i32
    %c0_i32_0 = arith.constant 0 : i32
    %c0_i32_1 = arith.constant 0 : i32
    return %c0_i32, %c0_i32_0 : i32, i32
  }
  func.func @transform_7(%arg0: i32) -> (i32, i32) {
    %c0_i32 = arith.constant 0 : i32
    %c0_i32_0 = arith.constant 0 : i32
    return %arg0, %c0_i32 : i32, i32
  }
}

</mosaic_0001>

<bundles_post_ra>
// kernel: r2z_forward.3
= control target key start
LH: loop header
LB: loop body
LE: loop exit
PB: predicated region body
PF: predicated region fallthrough
CT: control target
= control target key end

     0   :  { %s826_s24 = smov 0   ;;  %s931_s0 = inlined_call_operand.vmem [shape: f32[256,40], index: 0, kind: input, shape index: {}]   ;;  %s932_s1 = inlined_call_operand.vmem [shape: f32[40,40], index: 1, kind: input, shape index: {}]   ;;  %s933_s2 = inlined_call_operand.vmem [shape: f32[1,40], index: 2, kind: input, shape index: {}]   ;;  %s934_s3 = inlined_call_operand.vmem [shape: f32[40,40], index: 3, kind: input, shape index: {}]   ;;  %s935_s4 = inlined_call_operand.vmem [shape: f32[1,40], index: 4, kind: input, shape index: {}]   ;;  %s936_s5 = inlined_call_operand.vmem [shape: f32[40,2], index: 5, kind: input, shape index: {}]   ;;  %s937_s6 = inlined_call_operand.vmem [shape: f32[1,2], index: 6, kind: input, shape index: {}]   ;;  %s938_s7 = inlined_call_operand.vmem [shape: f32[256,2], index: 7, kind: output, shape index: {}]  }
   0x1 LB: > { %s671_s25 = sadd.s32 4294967295, %s784_s24   ;;  %p675_p0 = scmp.ge.s32.totalorder %s784_s24, 1  ;;  %s784_s24 = sphi %s826_s24, %s17_s24  }
   0x2   : > { %p238_p1 = scmp.lt.s32.totalorder %s784_s24, 5 }
   0x4   : > { %p239_p2 = pnand %p675_p0, %p238_p1 }
   0x5   : > { %v291_v0 = vld [vmem:[%s932_s1] sm:$0xff] (!%p239_p2)  ;;  %v292_v1 = vld [vmem:[%s932_s1 + $0x8] sm:$0xff] (!%p239_p2)  ;;  %v293_v2 = vld [vmem:[%s932_s1 + $0x10] sm:$0xff] (!%p239_p2)  ;;  %s676_s9 = sshll.u32 (!%p239_p2), %s671_s25, 3  ;;  %vm323_vm0 = vcmask (!%p239_p2), 1043456   ;;  %vm310_vm1 = vcmask (!%p239_p2), 326656  }
   0x6   : > { %242 = sbr.rel (%p239_p2) target bundleno = 690 (0x2b2), region = 48  ;;  %v300_v3 = vpack.c.bf16 (!%p239_p2), %v292_v1, %v291_v0  ;;  %v294_v4 = vld [vmem:[%s932_s1 + $0x18] sm:$0xff] (!%p239_p2)  ;;  %p271_p3 = scmp.lt.s32.totalorder (!%p239_p2), %s676_s9, 31  ;;  %v400_v5 = vld [vmem:[%s934_s3] sm:$0xff] (!%p239_p2)  ;;  %v401_v8 = vld [vmem:[%s934_s3 + $0x8] sm:$0xff] (!%p239_p2)  ;;  %vm606_vm2 = vcmask (!%p239_p2), 15360  }
   0x7   : > { %v301_v6 = vpack.c.bf16 (!%p239_p2), %v294_v4, %v293_v2  ;;  %v295_v7 = vld [vmem:[%s932_s1 + $0x20] sm:$0xff] (!%p239_p2)  ;;  %v409_v9 = vpack.c.bf16 (!%p239_p2), %v401_v8, %v400_v5  ;;  %v402_v24 = vld [vmem:[%s934_s3 + $0x10] sm:$0xff] (!%p239_p2)  ;;  %v403_v25 = vld [vmem:[%s934_s3 + $0x18] sm:$0xff] (!%p239_p2) }
   0x8   : > { %718 = vmatprep.subr.bf16.mxu0 (!%p239_p2), %v300_v3  ;;  %v302_v10 = vpack.c.bf16 (!%p239_p2), %v295_v7, %v295_v7  ;;  %v410_v26 = vpack.c.bf16 (!%p239_p2), %v403_v25, %v402_v24  ;;  %v404_v27 = vld [vmem:[%s934_s3 + $0x20] sm:$0xff] (!%p239_p2)  ;;  %v508_v31 = vld [vmem:[%s936_s5 + $0x8] sm:$0xff] (!%p239_p2)  ;;  %v509_v62 = vld [vmem:[%s936_s5 + $0x10] sm:$0xff] (!%p239_p2) }
   0x9   : > { %719 = vmatpush3.bf16.msra.mxu0 (!%p239_p2), %v300_v3  ;;  %732 = vmatprep.subr.bf16.mxu1 (!%p239_p2), %v409_v9  ;;  %v411_v28 = vpack.c.bf16 (!%p239_p2), %v404_v27, %v404_v27  ;;  %v507_v30 = vld [vmem:[%s936_s5] sm:$0xff] (!%p239_p2)  ;;  %v510_v63 = vld [vmem:[%s936_s5 + $0x18] sm:$0xff] (!%p239_p2) }
   0xa   : > { %720 = vmatprep.subr.bf16.mxu0 (!%p239_p2), %v301_v6  ;;  %733 = vmatpush3.bf16.msra.mxu1 (!%p239_p2), %v409_v9  ;;  %v325_v16 = vsel (!%p239_p2), %vm323_vm0, %v302_v10, 0  ;;  %v516_v32 = vpack.c.bf16 (!%p239_p2), %v508_v31, %v507_v30  ;;  %v680_v33 = vld [vmem:[%s933_s2] ss:$0 sm:$0xff] (!%p239_p2)  ;;  %v517_v0 = vpack.c.bf16 (!%p239_p2), %v510_v63, %v509_v62 }
   0xb   : > { %734 = vmatprep.subr.bf16.mxu1 (!%p239_p2), %v410_v26  ;;  %v432_v29 = vsel (!%p239_p2), %vm323_vm0, %v411_v28, 0  ;;  %v511_v1 = vld [vmem:[%s936_s5 + $0x20] sm:$0xff] (!%p239_p2) }
   0xc   : > { %v518_v2 = vpack.c.bf16 (!%p239_p2), %v511_v1, %v511_v1  ;;  %v685_v4 = vld [vmem:[%s935_s4] ss:$0 sm:$0xff] (!%p239_p2) }
   0xd   : > { %s940_s9 = smov (!%p271_p3, %s676_s9), 31  ;;  %721 = vmatpush3.bf16.msra.mxu0 %v301_v6 }
   0xe   : > { %s677_s18 = sshll.u32 %s940_s9, 3  ;;  %766 = vmatprep.subr.msk.bf16.mxu0 %vm323_vm0, %v302_v10  ;;  %735 = vmatpush3.bf16.msra.mxu1 %v410_v26  ;;  %v539_v3 = vsel %vm323_vm0, %v518_v2, 0 }
   0xf   : > { %s274_s21 = scalar_lea.vmem %s931_s0, %s677_s18  ;;  %767 = vmatprep.subr.msk.bf16.mxu1 %vm323_vm0, %v411_v28  ;;  %s280_s27 = scalar_lea.vmem %s938_s7, %s677_s18 }
  0x10   : > { %v283_v11 = vld [vmem:[%s274_s21] sm:$0xff]  ;;  %v284_v12 = vld [vmem:[%s274_s21 + $0x8] sm:$0xff]  ;;  %v285_v14 = vld [vmem:[%s274_s21 + $0x10] sm:$0xff] }
  0x11   : > { %v296_v13 = vpack.c.bf16 %v284_v12, %v283_v11  ;;  %v286_v15 = vld [vmem:[%s274_s21 + $0x18] sm:$0xff]  ;;  %v287_v17 = vld [vmem:[%s274_s21 + $0x20] sm:$0xff]  ;;  %v288_v18 = vld [vmem:[%s274_s21 + $0x28] sm:$0xff]  ;;  %723 = vmatpush3.bf16.msra.mxu0 %v325_v16 }
  0x12   : > { %v297_v19 = vpack.c.bf16 %v286_v15, %v285_v14  ;;  %v298_v20 = vpack.c.bf16 %v288_v18, %v287_v17  ;;  %v289_v21 = vld [vmem:[%s274_s21 + $0x30] sm:$0xff]  ;;  %v290_v22 = vld [vmem:[%s274_s21 + $0x38] sm:$0xff]  ;;  %737 = vmatpush3.bf16.msra.mxu1 %v432_v29  ;;  %746 = vmatprep.subr.bf16.mxu0 %v516_v32 }
  0x13   : > { %724 = vmatprep.mubr.msk.bf16.mxu0 %vm310_vm1, %v296_v13  ;;  %v299_v23 = vpack.c.bf16 %v290_v22, %v289_v21  ;;  %760 = vmatprep.subr.bf16.mxu1 %v516_v32 }
  0x14   : > { %725 = vmatmul.mubr.msk.bf16.vlgmr.msra.gmra.mrb[0].mxu0 %vm310_vm1, %v297_v19 }
  0x15   : > { %728 = vmatprep.mubr.msk.bf16.mxu0 %vm310_vm1, %v298_v20  ;;  %747 = vmatpush3.bf16.msra.mxu0 %v516_v32 }
  0x16   : > { %748 = vmatprep.subr.bf16.mxu0 %v517_v0 }
  0x19   : > { %749 = vmatpush3.bf16.msra.mxu0 %v517_v0 }
  0x1a   : > { %768 = vmatprep.subr.msk.bf16.mxu0 %vm323_vm0, %v518_v2 }
  0x1c   : > { %729 = vmatmul.mubr.msk.bf16.gmra.mrb[4].mxu0 %vm310_vm1, %v299_v23 }
  0x1d   : > { %751 = vmatpush3.bf16.msra.mxu0 %v539_v3 }
  0xe7   : > { %v726_v34 = vpop.f32.mrb[0].mxu0 }
  0xe8   : > { %v370_v35 = vadd.f32 %v726_v34, %v680_v33  ;;  %v361_v36 = vpop.f32.mrb[1].mxu0 }
  0xe9   : > { %v362_v37 = vadd.f32 %v680_v33, %v361_v36  ;;  %v727_v38 = vpop.f32.mrb[2].mxu0 }
  0xea   : > { %v373_v39 = vadd.f32 %v727_v38, %v680_v33  ;;  %v364_v40 = vpop.f32.mrb[3].mxu0  ;;  %v394_v42 = vmax.f32 %v370_v35, 0.0 }
  0xeb   : > { %v365_v41 = vadd.f32 %v680_v33, %v364_v40  ;;  %v392_v44 = vmax.f32 %v362_v37, 0.0 }
  0xec   : > { %v395_v43 = vmax.f32 %v373_v39, 0.0 }
  0xed   : > { %v393_v45 = vmax.f32 %v365_v41, 0.0 }
  0xee   : > { %v406_v46 = vpack.c.bf16 %v395_v43, %v394_v42 }
  0xef   : > { %v730_v47 = vpop.f32.mrb[4].mxu0  ;;  %v405_v48 = vpack.c.bf16 %v393_v45, %v392_v44 }
  0xf0   : > { %v386_v49 = vadd.f32 %v730_v47, %v680_v33  ;;  %v377_v50 = vpop.f32.mrb[5].mxu0 }
  0xf1   : > { %v378_v51 = vadd.f32 %v680_v33, %v377_v50  ;;  %v731_v52 = vpop.f32.mrb[6].mxu0  ;;  %738 = vmatprep.mubr.msk.bf16.mxu1 %vm310_vm1, %v405_v48 }
  0xf2   : > { %v389_v53 = vadd.f32 %v731_v52, %v680_v33  ;;  %v380_v54 = vpop.f32.mrb[7].mxu0  ;;  %739 = vmatmul.mubr.msk.bf16.vlgmr.msra.gmra.mrb[0].mxu1 %vm310_vm1, %v406_v46  ;;  %v398_v56 = vmax.f32 %v386_v49, 0.0 }
  0xf3   : > { %v381_v55 = vadd.f32 %v680_v33, %v380_v54  ;;  %763 = vmatpush3.bf16.msra.mxu1 %v516_v32  ;;  %v396_v58 = vmax.f32 %v378_v51, 0.0  ;;  %v690_v33 = vld [vmem:[%s937_s6] ss:$0 sm:$0xff] }
  0xf4   : > { %v399_v57 = vmax.f32 %v389_v53, 0.0  ;;  %761 = vmatprep.subr.bf16.mxu1 %v517_v0 }
  0xf5   : > { %v397_v59 = vmax.f32 %v381_v55, 0.0 }
  0xf6   : > { %v408_v60 = vpack.c.bf16 %v399_v57, %v398_v56 }
  0xf7   : > { %v407_v61 = vpack.c.bf16 %v397_v59, %v396_v58  ;;  %764 = vmatpush3.bf16.msra.mxu1 %v517_v0 }
  0xf8   : > { %769 = vmatprep.subr.msk.bf16.mxu1 %vm323_vm0, %v518_v2 }
  0xf9   : > { %742 = vmatprep.mubr.msk.bf16.mxu1 %vm310_vm1, %v407_v61 }
  0xfa   : > { %743 = vmatmul.mubr.msk.bf16.gmra.mrb[4].mxu1 %vm310_vm1, %v408_v60 }
  0xfb   : > { %765 = vmatpush3.bf16.msra.mxu1 %v539_v3 }
 0x1c5   : > { %v740_v5 = vpop.f32.mrb[0].mxu1 }
 0x1c6   : > { %v477_v6 = vadd.f32 %v740_v5, %v685_v4  ;;  %v468_v7 = vpop.f32.mrb[1].mxu1 }
 0x1c7   : > { %v469_v8 = vadd.f32 %v685_v4, %v468_v7  ;;  %v741_v9 = vpop.f32.mrb[2].mxu1 }
 0x1c8   : > { %v480_v10 = vadd.f32 %v741_v9, %v685_v4  ;;  %v471_v11 = vpop.f32.mrb[3].mxu1  ;;  %v501_v13 = vmax.f32 %v477_v6, 0.0 }
 0x1c9   : > { %v472_v12 = vadd.f32 %v685_v4, %v471_v11  ;;  %v499_v15 = vmax.f32 %v469_v8, 0.0 }
 0x1ca   : > { %v502_v14 = vmax.f32 %v480_v10, 0.0 }
 0x1cb   : > { %v500_v16 = vmax.f32 %v472_v12, 0.0 }
 0x1cc   : > { %v513_v17 = vpack.c.bf16 %v502_v14, %v501_v13 }
 0x1cd   : > { %v512_v18 = vpack.c.bf16 %v500_v16, %v499_v15  ;;  %v744_v19 = vpop.f32.mrb[4].mxu1 }
 0x1ce   : > { %v493_v20 = vadd.f32 %v744_v19, %v685_v4  ;;  %v484_v21 = vpop.f32.mrb[5].mxu1 }
 0x1cf   : > { %v485_v22 = vadd.f32 %v685_v4, %v484_v21  ;;  %v745_v23 = vpop.f32.mrb[6].mxu1  ;;  %752 = vmatprep.mubr.msk.bf16.mxu0 %vm310_vm1, %v512_v18 }
 0x1d0   : > { %v496_v24 = vadd.f32 %v745_v23, %v685_v4  ;;  %v487_v25 = vpop.f32.mrb[7].mxu1  ;;  %753 = vmatmul.mubr.msk.bf16.vlgmr.msra.gmra.mrb[8].mxu0 %vm310_vm1, %v513_v17  ;;  %v505_v27 = vmax.f32 %v493_v20, 0.0 }
 0x1d1   : > { %v488_v26 = vadd.f32 %v685_v4, %v487_v25  ;;  %v503_v29 = vmax.f32 %v485_v22, 0.0 }
 0x1d2   : > { %v506_v28 = vmax.f32 %v496_v24, 0.0 }
 0x1d3   : > { %v504_v30 = vmax.f32 %v488_v26, 0.0 }
 0x1d4   : > { %v515_v31 = vpack.c.bf16 %v506_v28, %v505_v27 }
 0x1d5   : > { %v514_v32 = vpack.c.bf16 %v504_v30, %v503_v29 }
 0x1d7   : > { %756 = vmatprep.mubr.msk.bf16.mxu1 %vm310_vm1, %v514_v32 }
 0x1d8   : > { %757 = vmatmul.mubr.msk.bf16.vlgmr.msra.gmra.mrb[8].mxu1 %vm310_vm1, %v515_v31 }
 0x2a3   : > { %v754_v34 = vpop.f32.mrb[8].mxu0 }
 0x2a4   : > { %v584_v35 = vadd.f32 %v754_v34, %v690_v33  ;;  %v575_v36 = vpop.f32.mrb[9].mxu0 }
 0x2a5   : > { %v576_v37 = vadd.f32 %v690_v33, %v575_v36  ;;  %v755_v38 = vpop.f32.mrb[10].mxu0 }
 0x2a6   : > { %609 = vst.msk [vmem:[%s280_s27 + $0x10] sm:$0xff] %vm606_vm2, %v584_v35  ;;  %v587_v39 = vadd.f32 %v755_v38, %v690_v33  ;;  %v578_v40 = vpop.f32.mrb[11].mxu0 }
 0x2a7   : > { %607 = vst.msk [vmem:[%s280_s27] sm:$0xff] %vm606_vm2, %v576_v37  ;;  %v579_v41 = vadd.f32 %v690_v33, %v578_v40 }
 0x2a8   : > { %610 = vst.msk [vmem:[%s280_s27 + $0x18] sm:$0xff] %vm606_vm2, %v587_v39 }
 0x2a9   : > { %608 = vst.msk [vmem:[%s280_s27 + $0x8] sm:$0xff] %vm606_vm2, %v579_v41 }
 0x2ab   : > { %v758_v42 = vpop.f32.mrb[8].mxu1 }
 0x2ac   : > { %v600_v43 = vadd.f32 %v758_v42, %v690_v33  ;;  %v591_v44 = vpop.f32.mrb[9].mxu1 }
 0x2ad   : > { %v592_v45 = vadd.f32 %v690_v33, %v591_v44  ;;  %v759_v46 = vpop.f32.mrb[10].mxu1 }
 0x2ae   : > { %613 = vst.msk [vmem:[%s280_s27 + $0x30] sm:$0xff] %vm606_vm2, %v600_v43  ;;  %v603_v47 = vadd.f32 %v759_v46, %v690_v33  ;;  %v594_v48 = vpop.f32.mrb[11].mxu1 }
 0x2af   : > { %611 = vst.msk [vmem:[%s280_s27 + $0x20] sm:$0xff] %vm606_vm2, %v592_v45  ;;  %v595_v49 = vadd.f32 %v690_v33, %v594_v48 }
 0x2b0   : > { %614 = vst.msk [vmem:[%s280_s27 + $0x38] sm:$0xff] %vm606_vm2, %v603_v47 }
 0x2b1   : > { %612 = vst.msk [vmem:[%s280_s27 + $0x28] sm:$0xff] %vm606_vm2, %v595_v49 }
 0x2b2 PF: > { %s17_s24 = sadd.s32 1, %s784_s24  }
 0x2b3   : > { %p14_p4 = scmp.ge.s32.totalorder %s17_s24, 6  }
 0x2b5   :  { %16 = sbr.rel (!%p14_p4) target bundleno = 1 (0x1), region = 78 }

// kernel: r2z_forward.2
= control target key start
LH: loop header
LB: loop body
LE: loop exit
PB: predicated region body
PF: predicated region fallthrough
CT: control target
= control target key end

     0   :  { %s1057_s15 = smov 0   ;;  %s1169_s0 = inlined_call_operand.vmem [shape: f32[256,40], index: 0, kind: input, shape index: {}]   ;;  %s1170_s1 = inlined_call_operand.vmem [shape: f32[40,40], index: 1, kind: input, shape index: {}]   ;;  %s1171_s2 = inlined_call_operand.vmem [shape: f32[1,40], index: 2, kind: input, shape index: {}]   ;;  %s1172_s3 = inlined_call_operand.vmem [shape: f32[4,1,40], index: 3, kind: output, shape index: {0}]   ;;  %s1173_s4 = inlined_call_operand.vmem [shape: f32[4,40,40], index: 4, kind: output, shape index: {1}]  }
   0x1 LB: > { %s1063_s16 = sadd.s32 4294967295, %s1025_s15   ;;  %p840_p0 = scmp.ge.s32.totalorder %s1025_s15, 1  ;;  %s1025_s15 = sphi %s1057_s15, %s15_s15  }
   0x2   : > { %p166_p1 = scmp.lt.s32.totalorder %s1025_s15, 5 }
   0x4   : > { %p167_p2 = pnand %p840_p0, %p166_p1 }
   0x5   : > { %p201_p3 = scmp.lt.s32.totalorder (!%p167_p2), %s1063_s16, 3  ;;  %v217_v0 = vld [vmem:[%s1170_s1] sm:$0xff] (!%p167_p2)  ;;  %v218_v1 = vld [vmem:[%s1170_s1 + $0x8] sm:$0xff] (!%p167_p2)  ;;  %v219_v2 = vld [vmem:[%s1170_s1 + $0x10] sm:$0xff] (!%p167_p2)  ;;  %s841_s23 = sshll.u32 (!%p167_p2), %s1063_s16, 3  ;;  %vm229_vm0 = vcmask (!%p167_p2), 326656  }
   0x6   : > { %170 = sbr.rel (%p167_p2) target bundleno = 954 (0x3ba), region = 32  ;;  %v969_v3 = vpack.c.bf16 (!%p167_p2), %v218_v1, %v217_v0  ;;  %v220_v4 = vld [vmem:[%s1170_s1 + $0x18] sm:$0xff] (!%p167_p2)  ;;  %p196_p4 = scmp.lt.s32.totalorder (!%p167_p2), %s841_s23, 31  ;;  %v221_v6 = vld [vmem:[%s1170_s1 + $0x20] sm:$0xff] (!%p167_p2) }
   0x7   : > { %v973_v5 = vpack.c.bf16 (!%p167_p2), %v220_v4, %v219_v2  ;;  %v844_v15 = vld [vmem:[%s1171_s2] ss:$0 sm:$0xff] (!%p167_p2)  ;;  %p853_p5 = scmp.eq.s32.totalorder (!%p167_p2), %s1063_s16, 3 }
   0x8   : > { %970 = vmatprep.subr.bf16.mxu0 (!%p167_p2), %v969_v3  ;;  %989 = vmatprep.subr.bf16.mxu1 (!%p167_p2), %v969_v3 }
   0x9   : > { %972 = vmatpush3.bf16.msra.mxu0 (!%p167_p2), %v969_v3  ;;  %992 = vmatpush3.bf16.msra.mxu1 (!%p167_p2), %v969_v3 }
   0xa   : > { %974 = vmatprep.subr.bf16.mxu0 (!%p167_p2), %v973_v5  ;;  %990 = vmatprep.subr.bf16.mxu1 (!%p167_p2), %v973_v5 }
   0xd   : > { %s202_s26 = scalar_select %p201_p3, %s1063_s16, 3  ;;  %976 = vmatpush3.bf16.msra.mxu0 %v973_v5  ;;  %993 = vmatpush3.bf16.msra.mxu1 %v973_v5 }
   0xe   : > { %s1175_s23 = smov (!%p196_p4, %s841_s23), 31  ;;  %907 = vmatprep.subr.mxu0 %v221_v6  ;;  %991 = vmatprep.subr.mxu1 %v221_v6  ;;  %v1027_v47 = vmov (!%p853_p5), 0.0|0.0   ;;  %vm1028_vm1 = vmmov (!%p853_p5), 0   ;;  %v1029_v52 = vmov (!%p853_p5), 0.0   ;;  %vm392_vm2 = vcmask (!%p853_p5), 319488  }
   0xf   : > { %s1085_s29 = scalar_lea.vmem %s1172_s3, %s202_s26  ;;  %s1005_s30 = smul.u32 40, %s202_s26  ;;  %vm426_vm3 = vcmask (!%p853_p5), 523264  }
  0x10   : > { %s842_s5 = sshll.u32 %s1175_s23, 3 }
  0x11   : > { %s1090_s8 = scalar_lea.vmem %s1173_s4, %s1005_s30  ;;  %s199_s13 = scalar_lea.vmem %s1169_s0, %s842_s5  ;;  %908 = vmatpush3.msra.mxu0 %v221_v6  ;;  %994 = vmatpush3.msra.mxu1 %v221_v6 }
  0x12   : > { %v209_v7 = vld [vmem:[%s199_s13] sm:$0xff]  ;;  %v210_v9 = vld [vmem:[%s199_s13 + $0x8] sm:$0xff]  ;;  %v211_v11 = vld [vmem:[%s199_s13 + $0x10] sm:$0xff]  ;;  %977 = vmatprep.subr.bf16.mxu0 (!%p853_p5), %v1027_v47  ;;  %995 = vmatprep.subr.bf16.mxu1 (!%p853_p5), %v1027_v47 }
  0x13   : > { %v213_v8 = vld [vmem:[%s199_s13 + $0x20] sm:$0xff]  ;;  %909 = vmatprep.mubr.msk.f32.mxu0 %vm229_vm0, %v209_v7  ;;  %v214_v10 = vld [vmem:[%s199_s13 + $0x28] sm:$0xff]  ;;  %v215_v12 = vld [vmem:[%s199_s13 + $0x30] sm:$0xff] }
  0x14   : > { %915 = vmatprep.mubr.msk.f32.mxu1 %vm229_vm0, %v213_v8  ;;  %910 = vmatmul.mubr.msk.f32.vlgmr.msra.gmra.mrb[0].mxu0 %vm229_vm0, %v210_v9  ;;  %v212_v13 = vld [vmem:[%s199_s13 + $0x18] sm:$0xff] }
  0x15   : > { %916 = vmatmul.mubr.msk.f32.vlgmr.msra.gmra.mrb[0].mxu1 %vm229_vm0, %v214_v10  ;;  %912 = vmatprep.mubr.msk.f32.mxu0 %vm229_vm0, %v211_v11  ;;  %v216_v14 = vld [vmem:[%s199_s13 + $0x38] sm:$0xff] }
  0x16   : > { %918 = vmatprep.mubr.msk.f32.mxu1 %vm229_vm0, %v215_v12 }
  0x18   : > { %913 = vmatmul.mubr.msk.f32.gmra.mrb[2].mxu0 %vm229_vm0, %v212_v13 }
  0x19   : > { %919 = vmatmul.mubr.msk.f32.gmra.mrb[2].mxu1 %vm229_vm0, %v216_v14  ;;  %937 = vmatprep.mubr.msk.f32.mxu0 (!%p853_p5), %vm1028_vm1, %v1029_v52 }
  0x1a   : > { %946 = vmatprep.mubr.msk.f32.mxu1 (!%p853_p5), %vm1028_vm1, %v1029_v52 }
  0xe7   : > { %v911_v16 = vpop.f32.mrb[0].mxu0 }
  0xe8   : > { %v917_v17 = vpop.f32.mrb[0].mxu1  ;;  %v326_v18 = vadd.f32 %v911_v16, %v844_v15  ;;  %v320_v20 = vpop.f32.mrb[1].mxu0 }
  0xe9   : > { %v346_v19 = vadd.f32 %v917_v17, %v844_v15  ;;  %v340_v21 = vpop.f32.mrb[1].mxu1  ;;  %v321_v22 = vadd.f32 %v844_v15, %v320_v20 }
  0xea   : > { %v341_v23 = vadd.f32 %v844_v15, %v340_v21  ;;  %v360_v24 = vmax.f32 %v326_v18, 0.0  ;;  %370 = sbr.rel (%p853_p5) target bundleno = 595 (0x253), region = 36 }
  0xeb   : > { %v1109_v25 = vmax.f32 %v346_v19, 0.0  ;;  %v1111_v26 = vmax.f32 %v321_v22, 0.0  ;;  %v914_v28 = vpop.f32.mrb[2].mxu0 }
  0xec   : > { %v363_v27 = vmax.f32 %v341_v23, 0.0  ;;  %v920_v29 = vpop.f32.mrb[2].mxu1  ;;  %v336_v30 = vadd.f32 %v914_v28, %v844_v15  ;;  %v330_v32 = vpop.f32.mrb[3].mxu0  ;;  %v372_v41 = vsel (!%p853_p5), %vm229_vm0, %v360_v24, 0.0 }
  0xed   : > { %v356_v31 = vadd.f32 %v920_v29, %v844_v15  ;;  %v350_v33 = vpop.f32.mrb[3].mxu1  ;;  %v331_v34 = vadd.f32 %v844_v15, %v330_v32  ;;  %394 = vxpose.xlu0.b32.start [1/8] (short) (narrow) (!%p853_p5), %v1111_v26, 40  ;;  %v371_v40 = vsel (!%p853_p5), %vm229_vm0, %v1111_v26, 0.0  ;;  %v978_v45 = vpack.c.bf16 (!%p853_p5), %v360_v24, %v1111_v26 }
  0xee   : > { %v351_v35 = vadd.f32 %v844_v15, %v350_v33  ;;  %v362_v36 = vmax.f32 %v336_v30, 0.0  ;;  %v373_v43 = vadd.f32 (!%p853_p5), %v372_v41, %v371_v40  ;;  %v378_v48 = vsel (!%p853_p5), %vm229_vm0, %v363_v27, 0.0 }
  0xef   : > { %v366_v37 = vmax.f32 %v356_v31, 0.0  ;;  %v361_v38 = vmax.f32 %v331_v34, 0.0  ;;  %979 = vmatpush3.bf16.msra.mxu0 (!%p853_p5), %v978_v45  ;;  %999 = vmatpush3.bf16.msra.mxu1 (!%p853_p5), %v978_v45  ;;  %v380_v51 = vsel (!%p853_p5), %vm229_vm0, %v1109_v25, 0.0  ;;  %v984_v55 = vpack.c.bf16 (!%p853_p5), %v1109_v25, %v363_v27 }
  0xf0   : > { %v365_v39 = vmax.f32 %v351_v35, 0.0  ;;  %v376_v44 = vsel (!%p853_p5), %vm229_vm0, %v362_v36, 0.0  ;;  %980 = vmatprep.subr.bf16.mxu0 (!%p853_p5), %v1027_v47  ;;  %996 = vmatprep.subr.bf16.mxu1 (!%p853_p5), %v1027_v47 }
  0xf1   : > { %v374_v42 = vsel %vm229_vm0, %v361_v38, 0.0  ;;  %395 = vxpose.xlu0.b32.cont [2/8] (short) (narrow) %v360_v24, 40  ;;  %v981_v49 = vpack.c.bf16 %v362_v36, %v361_v38  ;;  %v384_v57 = vsel %vm229_vm0, %v366_v37, 0.0 }
  0xf2   : > { %v375_v46 = vadd.f32 %v374_v42, %v373_v43  ;;  %v382_v54 = vsel %vm229_vm0, %v365_v39, 0.0  ;;  %v987_v59 = vpack.c.bf16 %v366_v37, %v365_v39 }
  0xf3   : > { %982 = vmatpush3.bf16.msra.mxu0 %v981_v49  ;;  %1000 = vmatpush3.bf16.msra.mxu1 %v981_v49 }
  0xf4   : > { %v377_v50 = vadd.f32 %v376_v44, %v375_v46  ;;  %983 = vmatprep.subr.bf16.mxu0 %v1027_v47  ;;  %997 = vmatprep.subr.bf16.mxu1 %v1027_v47 }
  0xf5   : > { %396 = vxpose.xlu0.b32.cont [3/8] (short) (narrow) %v361_v38, 40 }
  0xf6   : > { %v379_v53 = vadd.f32 %v378_v48, %v377_v50 }
  0xf7   : > { %985 = vmatpush3.bf16.msra.mxu0 %v984_v55  ;;  %1001 = vmatpush3.bf16.msra.mxu1 %v984_v55 }
  0xf8   : > { %v381_v56 = vadd.f32 %v380_v51, %v379_v53  ;;  %986 = vmatprep.subr.bf16.mxu0 %v1027_v47  ;;  %998 = vmatprep.subr.bf16.mxu1 %v1027_v47 }
  0xf9   : > { %397 = vxpose.xlu0.b32.cont [4/8] (short) (narrow) %v362_v36, 40 }
  0xfa   : > { %v383_v58 = vadd.f32 %v382_v54, %v381_v56 }
  0xfb   : > { %988 = vmatpush3.bf16.msra.mxu0 %v987_v59  ;;  %1002 = vmatpush3.bf16.msra.mxu1 %v987_v59 }
  0xfc   : > { %v385_v60 = vadd.f32 %v384_v57, %v383_v58 }
  0xfd   : > { %398 = vxpose.xlu0.b32.cont [5/8] (short) (narrow) %v363_v27, 40 }
  0xfe   : > { %v386_v61 = vrot.slane %v385_v60, 4 }
 0x100   : > { %v387_v62 = vadd.f32 %v386_v61, %v385_v60 }
 0x101   : > { %399 = vxpose.xlu0.b32.cont [6/8] (short) (narrow) %v1109_v25, 40 }
 0x102   : > { %v388_v63 = vrot.slane %v387_v62, 2 }
 0x104   : > { %v389_v0 = vadd.f32 %v388_v63, %v387_v62 }
 0x105   : > { %400 = vxpose.xlu0.b32.cont [7/8] (short) (narrow) %v365_v39, 40 }
 0x106   : > { %v390_v1 = vrot.slane %v389_v0, 1 }
 0x108   : > { %v391_v2 = vadd.f32 %v390_v1, %v389_v0 }
 0x109   : > { %401 = vxpose.xlu0.b32.end [8/8] (short) (narrow) %v366_v37, 40 }
 0x10a   : > { %393 = vst.msk [vmem:[%s1085_s29] sm:$0x1] %vm392_vm2, %v391_v2 }
 0x16d   : > { %v410_v3 = vpop.trf.xlu0 }
 0x16e   : > { %938 = vmatmul.mubr.msk.f32.vlgmr.msra.gmra.mrb[0].mxu0 %vm426_vm3, %v410_v3 }
 0x16f   : > { %940 = vmatprep.mubr.msk.f32.mxu0 %vm1028_vm1, %v1029_v52 }
 0x171   : > { %v411_v4 = vpop.trf.xlu0 }
 0x172   : > { %941 = vmatmul.mubr.msk.f32.gmra.mrb[2].mxu0 %vm426_vm3, %v411_v4 }
 0x173   : > { %943 = vmatprep.mubr.msk.f32.mxu0 %vm1028_vm1, %v1029_v52 }
 0x175   : > { %v412_v5 = vpop.trf.xlu0 }
 0x176   : > { %944 = vmatmul.mubr.msk.f32.gmra.mrb[4].mxu0 %vm426_vm3, %v412_v5 }
 0x179   : > { %v413_v6 = vpop.trf.xlu0 }
 0x17a   : > { %947 = vmatmul.mubr.msk.f32.vlgmr.msra.gmra.mrb[0].mxu1 %vm426_vm3, %v413_v6 }
 0x17b   : > { %949 = vmatprep.mubr.msk.f32.mxu1 %vm1028_vm1, %v1029_v52 }
 0x17d   : > { %v414_v7 = vpop.trf.xlu0 }
 0x17e   : > { %950 = vmatmul.mubr.msk.f32.gmra.mrb[2].mxu1 %vm426_vm3, %v414_v7 }
 0x241   : > { %v508_v8 = vpop.f32.mrb[0].mxu0 }
 0x242   : > { %532 = vst.msk [vmem:[%s1090_s8] sm:$0xff] %vm229_vm0, %v508_v8  ;;  %v939_v9 = vpop.f32.mrb[1].mxu0 }
 0x245   : > { %v513_v10 = vpop.f32.mrb[2].mxu0 }
 0x246   : > { %533 = vst.msk [vmem:[%s1090_s8 + $0x8] sm:$0xff] %vm229_vm0, %v513_v10  ;;  %v942_v11 = vpop.f32.mrb[3].mxu0 }
 0x249   : > { %v518_v12 = vpop.f32.mrb[4].mxu0 }
 0x24a   : > { %534 = vst.msk [vmem:[%s1090_s8 + $0x10] sm:$0xff] %vm229_vm0, %v518_v12  ;;  %v945_v13 = vpop.f32.mrb[5].mxu0 }
 0x24d   : > { %v523_v14 = vpop.f32.mrb[0].mxu1 }
 0x24e   : > { %535 = vst.msk [vmem:[%s1090_s8 + $0x18] sm:$0xff] %vm229_vm0, %v523_v14  ;;  %v948_v15 = vpop.f32.mrb[1].mxu1 }
 0x251   : > { %v528_v16 = vpop.f32.mrb[2].mxu1 }
 0x252   : > { %536 = vst.msk [vmem:[%s1090_s8 + $0x20] sm:$0xff] %vm229_vm0, %v528_v16  ;;  %v951_v17 = vpop.f32.mrb[3].mxu1 }
 0x253 PF: > { %p859_p6 = scmp.ne.s32.totalorder %s1063_s16, 3 }
 0x254   : > { %613 = vxpose.xlu0.b32.start.end [1/1] (short) (narrow) (!%p859_p6), %v1111_v26, 40  ;;  %v590_v18 = vsel (!%p859_p6), %vm229_vm0, %v1111_v26, 0.0  ;;  %v1030_v20 = vmov (!%p859_p6), 0.0   ;;  %vm1031_vm4 = vmmov (!%p859_p6), 0   ;;  %vm611_vm5 = vcmask (!%p859_p6), 319488  }
 0x255   : > { %540 = sbr.rel (%p859_p6) target bundleno = 954 (0x3ba), region = 40  ;;  %v605_v19 = vrot.slane (!%p859_p6), %v590_v18, 4  ;;  %952 = vmatprep.subr.mxu0 (!%p859_p6), %v1030_v20  ;;  %954 = vmatprep.mubr.msk.f32.mxu0 (!%p859_p6), %vm1031_vm4, %v1030_v20  ;;  %vm645_vm6 = vcmask (!%p859_p6), 523264  }
 0x256   : > { %953 = vmatpush3.msra.mxu0 (!%p859_p6), %v1111_v26  ;;  %1003 = vmatprep.subr.mxu1 (!%p859_p6), %v1030_v20 }
 0x257   : > { %v606_v21 = vadd.f32 (!%p859_p6), %v605_v19, %v590_v18  ;;  %1004 = vmatpush3.msra.mxu1 (!%p859_p6), %v1111_v26  ;;  %963 = vmatprep.mubr.msk.f32.mxu1 (!%p859_p6), %vm1031_vm4, %v1030_v20 }
 0x259   : > { %v607_v22 = vrot.slane (!%p859_p6), %v606_v21, 2 }
 0x25b   : > { %v608_v23 = vadd.f32 (!%p859_p6), %v607_v22, %v606_v21 }
 0x25d   : > { %v609_v24 = vrot.slane %v608_v23, 1 }
 0x25f   : > { %v610_v25 = vadd.f32 %v609_v24, %v608_v23 }
 0x261   : > { %612 = vst.msk [vmem:[%s1085_s29] sm:$0x1] %vm611_vm5, %v610_v25 }
 0x2d4   : > { %v629_v27 = vpop.trf.xlu0 }
 0x2d5   : > { %955 = vmatmul.mubr.msk.f32.vlgmr.msra.gmra.mrb[0].mxu0 %vm645_vm6, %v629_v27 }
 0x2d6   : > { %957 = vmatprep.mubr.msk.f32.mxu0 %vm1031_vm4, %v1030_v20 }
 0x2d8   : > { %v630_v28 = vpop.trf.xlu0 }
 0x2d9   : > { %958 = vmatmul.mubr.msk.f32.gmra.mrb[2].mxu0 %vm645_vm6, %v630_v28 }
 0x2da   : > { %960 = vmatprep.mubr.msk.f32.mxu0 %vm1031_vm4, %v1030_v20 }
 0x2dc   : > { %v631_v26 = vpop.trf.xlu0 }
 0x2dd   : > { %961 = vmatmul.mubr.msk.f32.gmra.mrb[4].mxu0 %vm645_vm6, %v631_v26 }
 0x2e0   : > { %v632_v29 = vpop.trf.xlu0 }
 0x2e1   : > { %964 = vmatmul.mubr.msk.f32.vlgmr.msra.gmra.mrb[0].mxu1 %vm645_vm6, %v632_v29 }
 0x2e2   : > { %966 = vmatprep.mubr.msk.f32.mxu1 %vm1031_vm4, %v1030_v20 }
 0x2e4   : > { %v633_v30 = vpop.trf.xlu0 }
 0x2e5   : > { %967 = vmatmul.mubr.msk.f32.gmra.mrb[2].mxu1 %vm645_vm6, %v633_v30 }
 0x3a8   : > { %v727_v31 = vpop.f32.mrb[0].mxu0 }
 0x3a9   : > { %751 = vst.msk [vmem:[%s1090_s8] sm:$0xff] %vm229_vm0, %v727_v31  ;;  %v956_v32 = vpop.f32.mrb[1].mxu0 }
 0x3ac   : > { %v732_v33 = vpop.f32.mrb[2].mxu0 }
 0x3ad   : > { %752 = vst.msk [vmem:[%s1090_s8 + $0x8] sm:$0xff] %vm229_vm0, %v732_v33  ;;  %v959_v34 = vpop.f32.mrb[3].mxu0 }
 0x3b0   : > { %v737_v35 = vpop.f32.mrb[4].mxu0 }
 0x3b1   : > { %753 = vst.msk [vmem:[%s1090_s8 + $0x10] sm:$0xff] %vm229_vm0, %v737_v35  ;;  %v962_v36 = vpop.f32.mrb[5].mxu0 }
 0x3b4   : > { %v742_v37 = vpop.f32.mrb[0].mxu1 }
 0x3b5   : > { %754 = vst.msk [vmem:[%s1090_s8 + $0x18] sm:$0xff] %vm229_vm0, %v742_v37  ;;  %v965_v38 = vpop.f32.mrb[1].mxu1 }
 0x3b8   : > { %v747_v39 = vpop.f32.mrb[2].mxu1 }
 0x3b9   : > { %755 = vst.msk [vmem:[%s1090_s8 + $0x20] sm:$0xff] %vm229_vm0, %v747_v39  ;;  %v968_v40 = vpop.f32.mrb[3].mxu1 }
 0x3ba PF: > { %s15_s15 = sadd.s32 1, %s1025_s15  }
 0x3bb   : > { %p12_p7 = scmp.ge.s32.totalorder %s15_s15, 6  }
 0x3bd   :  { %14 = sbr.rel (!%p12_p7) target bundleno = 1 (0x1), region = 82 }

</bundles_post_ra>
